<compile_context>
chip_gen: v5e
topology: v5e:2x2
jax: 0.10.0
libtpu: 0.0.40
codegen_flags: <defaults>
</compile_context>

<pallas_src>
import functools

import jax
import jax.numpy as jnp
from jax.experimental import pallas as pl
from jax.experimental.pallas import tpu as pltpu


def _round_up(x: int, m: int) -> int:
    return (x + m - 1) // m * m


# ---------------------------------------------------------------------------
# Generation detection (host-side, cached; safe during jit tracing).
# ---------------------------------------------------------------------------
@functools.lru_cache(maxsize=1)
def _tpu_config():
    kind = ""
    try:
        kind = jax.devices()[0].device_kind.lower()
    except Exception:
        pass
    vmem_phys = None
    try:
        vmem_phys = int(pltpu.get_tpu_info().vmem_capacity_bytes)
    except Exception:
        vmem_phys = None

    is_v7 = ("v7" in kind) or ("tpu7" in kind) or ("7x" in kind)
    is_v6 = "v6" in kind
    is_v5e = ("v5e" in kind) or ("v5 lite" in kind) or ("v5lite" in kind)

    if vmem_phys is None:
        vmem_phys = (64 << 20) if is_v7 else (128 << 20)

    if is_v7 or vmem_phys <= (64 << 20):
        # v7x: 64 MiB/TC physical. Never request it all; knee ~310 flop/byte.
        return dict(name="v7x", vmem_cap=min(52 << 20, int(vmem_phys * 0.82)),
                    align=256, tm=512, tk=512, two_cores=True)
    if is_v6:
        # v6e: 128 MiB VMEM, knee ~680 flop/byte -> biggest tiles / resident W.
        return dict(name="v6e", vmem_cap=min(100 << 20, int(vmem_phys * 0.80)),
                    align=256, tm=1024, tk=1024, two_cores=False)
    if is_v5e:
        return dict(name="v5e", vmem_cap=min(100 << 20, int(vmem_phys * 0.80)),
                    align=128, tm=512, tk=1024, two_cores=False)
    # Unknown TPU: conservative settings that compile everywhere.
    return dict(name="tpu", vmem_cap=min(64 << 20, int(vmem_phys * 0.75)),
                align=128, tm=512, tk=512, two_cores=False)


# ---------------------------------------------------------------------------
# VMEM footprint models (double-buffered BlockSpec allocations + live temps).
# ---------------------------------------------------------------------------
def _chunked_footprint(tm, dm, tk, ib, wb, ob):
    est = 2 * tm * dm * (ib + ob)          # x / out tiles (double-buffered)
    est += 2 * (dm * tk + tk * dm) * wb    # W1 / W2 chunks (double-buffered)
    est += 2 * (tk + dm) * wb              # b1 / b2
    est += tm * dm * 4                     # f32 accumulator scratch
    est += tm * tk * 4                     # live f32 h chunk
    return est


def _resident_footprint(tm, dm, dff, ib, wb, ob):
    est = 2 * tm * dm * (ib + ob)              # x / out tiles (double-buffered)
    est += 2 * (2 * dm * dff + dff + dm) * wb  # W1,W2,b1,b2 (2x buffer alloc)
    est += tm * dff * 4                        # live f32 h
    est += tm * dm * 4                         # live f32 out before cast
    return est


# ---------------------------------------------------------------------------
# Kernels.
# ---------------------------------------------------------------------------
def _ffn_chunked_kernel(x_ref, w1_ref, b1_ref, w2_ref, b2_ref, o_ref, acc_ref):
    """Grid = (row_tiles, d_ff_chunks). d_ff chunk axis is a reduction."""
    k = pl.program_id(1)

    @pl.when(k == 0)
    def _init():
        acc_ref[...] = jnp.zeros_like(acc_ref)

    # h = relu(x @ W1[:, chunk] + b1[chunk]); native-dtype MXU feed, f32 acc.
    h = jnp.dot(x_ref[...], w1_ref[...], preferred_element_type=jnp.float32)
    h = jnp.maximum(h + b1_ref[...], 0.0)
    # dropout: identity (eval-mode nn.Dropout forward).
    acc_ref[...] += jnp.dot(h.astype(w2_ref.dtype), w2_ref[...],
                            preferred_element_type=jnp.float32)

    @pl.when(k == pl.num_programs(1) - 1)
    def _finalize():
        o_ref[...] = (acc_ref[...] + b2_ref[...]).astype(o_ref.dtype)


def _ffn_resident_kernel(x_ref, w1_ref, b1_ref, w2_ref, b2_ref, o_ref):
    """Grid = (row_tiles,). Full weights VMEM-resident, DMA'd from HBM once."""
    h = jnp.dot(x_ref[...], w1_ref[...], preferred_element_type=jnp.float32)
    h = jnp.maximum(h + b1_ref[...], 0.0)
    # dropout: identity (eval-mode nn.Dropout forward).
    out = jnp.dot(h.astype(w2_ref.dtype), w2_ref[...],
                  preferred_element_type=jnp.float32)
    o_ref[...] = (out + b2_ref[...]).astype(o_ref.dtype)


# ---------------------------------------------------------------------------
# Wrapper-side helpers.
# ---------------------------------------------------------------------------
def _pad2(a, rows, cols):
    if rows == 0 and cols == 0:
        return a
    return jnp.pad(a, ((0, rows), (0, cols)))


def pad_ff_params(w1, b1, w2, b2, *, align=None):
    """Pad weights/biases ONCE to the TPU-generation feature alignment.

    Call at init time and pass the padded params to ff_layer so the per-call
    jnp.pad of the weights (a full extra HBM copy) disappears.  Zero-padded
    rows/columns are numerically inert through bias + relu + matmul.
    """
    align = align or _tpu_config()["align"]
    d_model, d_ff = w1.shape
    dm = _round_up(d_model, align)
    dff = _round_up(d_ff, align)
    w1p = _pad2(w1, dm - d_model, dff - d_ff)
    w2p = _pad2(w2, dff - d_ff, dm - d_model)
    b1p = b1 if d_ff == dff else jnp.pad(b1, (0, dff - d_ff))
    b2p = b2 if d_model == dm else jnp.pad(b2, (0, dm - d_model))
    return w1p, b1p, w2p, b2p


@functools.partial(jax.jit, static_argnames=("tm", "tk_ff"))
def ff_layer(x, w1, b1, w2, b2, *, tm=None, tk_ff=None):
    """y = relu(x @ W1 + b1) @ W2 + b2   (dropout = identity, eval mode).

    x:  [..., d_model]
    w1: [d_model(_padded), d_ff(_padded)]   (nn.Linear weight, pre-transposed)
    w2: [d_ff(_padded), d_model(_padded)]
    Weights may be pre-padded via pad_ff_params (recommended).
    """
    cfg = _tpu_config()
    align = cfg["align"]
    cap = cfg["vmem_cap"]

    orig_shape = x.shape
    d_model = x.shape[-1]
    M = 1
    for s in x.shape[:-1]:
        M *= int(s)
    M = max(M, 1)

    dm_w, dff_w = w1.shape                      # possibly pre-padded
    d_model_p = _round_up(max(d_model, dm_w), align)
    d_ff_p = _round_up(dff_w, align)

    ib = jnp.dtype(x.dtype).itemsize
    wb = jnp.dtype(w1.dtype).itemsize
    ob = ib

    # ---- row tile selection -------------------------------------------------
    M_p8 = _round_up(M, 8)
    tm_sel = tm if tm is not None else min(cfg["tm"], M_p8)
    tm_sel = max(8, _round_up(tm_sel, 8))

    # v7x: make sure >= 2 row tiles exist so both TensorCores get work.
    if tm is None and cfg["two_cores"] and M_p8 >= 16:
        while tm_sel > 8 and pl.cdiv(M_p8, tm_sel) < 2:
            tm_sel = max(8, _round_up(tm_sel // 2, 8))

    # Prefer a tm that divides the (8-aligned) row count -> no row padding.
    if tm is None and M_p8 % tm_sel != 0:
        cand = tm_sel - (tm_sel % 8)
        while cand >= max(8, tm_sel // 2):
            if M_p8 % cand == 0:
                tm_sel = cand
                break
            cand -= 8

    # ---- variant selection: resident weights vs. chunked d_ff streaming ----
    use_resident = (
        tk_ff is None
        and _resident_footprint(tm_sel, d_model_p, d_ff_p, ib, wb, ob)
        <= int(0.85 * cap)
    )

    if use_resident:
        tk_sel = d_ff_p
        footprint = _resident_footprint(tm_sel, d_model_p, d_ff_p, ib, wb, ob)
    else:
        tk_sel = tk_ff if tk_ff is not None else min(cfg["tk"], d_ff_p)
        tk_sel = max(128, _round_up(tk_sel, 128))
        # Graceful degradation: shrink auto-chosen tiles until the
        # double-buffered footprint fits under the generation's VMEM cap.
        for _ in range(16):
            if (_chunked_footprint(tm_sel, d_model_p, tk_sel, ib, wb, ob)
                    <= int(0.85 * cap)):
                break
            if tk_ff is None and tk_sel > 256:
                tk_sel = max(256, tk_sel // 2)
            elif tm is None and tm_sel > 64:
                tm_sel = max(64, _round_up(tm_sel // 2, 8))
            else:
                break
        footprint = _chunked_footprint(tm_sel, d_model_p, tk_sel, ib, wb, ob)

    d_ff_p = _round_up(d_ff_p, tk_sel)
    M_p = _round_up(M, tm_sel)

    # ---- pad operands only when needed (pre-padded weights -> no-ops) ------
    x2d = x.reshape(M, d_model)
    x2d = _pad2(x2d, M_p - M, d_model_p - d_model)
    w1_p = _pad2(w1, d_model_p - dm_w, d_ff_p - dff_w)
    w2_p = _pad2(w2, d_ff_p - dff_w, d_model_p - dm_w)
    b1_p = (b1 if b1.shape[0] == d_ff_p
            else jnp.pad(b1, (0, d_ff_p - b1.shape[0]))).reshape(1, d_ff_p)
    b2_p = (b2 if b2.shape[0] == d_model_p
            else jnp.pad(b2, (0, d_model_p - b2.shape[0]))).reshape(1, d_model_p)

    # ---- footprint-derived scoped VMEM (generation-aware hard cap) ---------
    vmem_limit = int(footprint + max(footprint // 4, 4 << 20))
    vmem_limit = max(32 << 20, min(vmem_limit, cap))

    row_tiles = M_p // tm_sel

    if use_resident:
        out2d = pl.pallas_call(
            _ffn_resident_kernel,
            out_shape=jax.ShapeDtypeStruct((M_p, d_model_p), x.dtype),
            grid_spec=pltpu.PrefetchScalarGridSpec(
                num_scalar_prefetch=0,
                grid=(row_tiles,),
                in_specs=[
                    pl.BlockSpec((tm_sel, d_model_p), lambda i: (i, 0)),  # x
                    pl.BlockSpec((d_model_p, d_ff_p), lambda i: (0, 0)),  # W1
                    pl.BlockSpec((1, d_ff_p), lambda i: (0, 0)),          # b1
                    pl.BlockSpec((d_ff_p, d_model_p), lambda i: (0, 0)),  # W2
                    pl.BlockSpec((1, d_model_p), lambda i: (0, 0)),       # b2
                ],
                out_specs=pl.BlockSpec((tm_sel, d_model_p), lambda i: (i, 0)),
            ),
            compiler_params=pltpu.CompilerParams(
                dimension_semantics=("parallel",),
                vmem_limit_bytes=vmem_limit,
            ),
        )(x2d, w1_p, b1_p, w2_p, b2_p)
    else:
        out2d = pl.pallas_call(
            _ffn_chunked_kernel,
            out_shape=jax.ShapeDtypeStruct((M_p, d_model_p), x.dtype),
            grid_spec=pltpu.PrefetchScalarGridSpec(
                num_scalar_prefetch=0,
                grid=(row_tiles, d_ff_p // tk_sel),
                in_specs=[
                    pl.BlockSpec((tm_sel, d_model_p), lambda i, k: (i, 0)),   # x
                    pl.BlockSpec((d_model_p, tk_sel), lambda i, k: (0, k)),   # W1
                    pl.BlockSpec((1, tk_sel), lambda i, k: (0, k)),           # b1
                    pl.BlockSpec((tk_sel, d_model_p), lambda i, k: (k, 0)),   # W2
                    pl.BlockSpec((1, d_model_p), lambda i, k: (0, 0)),        # b2
                ],
                out_specs=pl.BlockSpec((tm_sel, d_model_p), lambda i, k: (i, 0)),
                scratch_shapes=[pltpu.VMEM((tm_sel, d_model_p), jnp.float32)],
            ),
            compiler_params=pltpu.CompilerParams(
                dimension_semantics=("parallel", "arbitrary"),
                vmem_limit_bytes=vmem_limit,
            ),
        )(x2d, w1_p, b1_p, w2_p, b2_p)

    if M_p != M or d_model_p != d_model:
        out2d = out2d[:M, :d_model]
    return out2d.reshape(orig_shape)


def init_ff_params(key, d_model, d_ff, dtype=jnp.float32):
    """nn.Linear-style init (uniform +/- 1/sqrt(fan_in)), weights stored
    pre-transposed to (in_features, out_features)."""
    k1, k2, k3, k4 = jax.random.split(key, 4)
    bound1 = 1.0 / (d_model ** 0.5)
    bound2 = 1.0 / (d_ff ** 0.5)
    w1 = jax.random.uniform(k1, (d_model, d_ff), dtype, -bound1, bound1)
    b1 = jax.random.uniform(k2, (d_ff,), dtype, -bound1, bound1)
    w2 = jax.random.uniform(k3, (d_ff, d_model), dtype, -bound2, bound2)
    b2 = jax.random.uniform(k4, (d_model,), dtype, -bound2, bound2)
    return w1, b1, w2, b2


if __name__ == "__main__":
    # Small shapes consistent with the module: batch=2, seq=8, d_model=32, d_ff=64
    B, S, d_model, d_ff = 2, 8, 32, 64
    key = jax.random.PRNGKey(0)
    kx, kp = jax.random.split(key)

    x = jax.random.normal(kx, (B, S, d_model), jnp.float32)
    w1, b1, w2, b2 = init_ff_params(kp, d_model, d_ff, dtype=jnp.float32)

    # Pure-JAX f32 reference of the module's eval-mode forward.
    ref = jnp.maximum(x @ w1 + b1, 0.0) @ w2 + b2

    # 1) f32 path: strict numerical check.
    out_f32 = ff_layer(x, w1, b1, w2, b2)
    jax.block_until_ready(out_f32)
    assert out_f32.shape == (B, S, d_model)
    assert jnp.allclose(out_f32, ref, atol=1e-4, rtol=1e-4)

    # 2) Pre-padded weights (recommended usage: pad once, no per-call HBM copy).
    w1p, b1p, w2p, b2p = pad_ff_params(w1, b1, w2, b2)
    out_pp = ff_layer(x, w1p, b1p, w2p, b2p)
    jax.block_until_ready(out_pp)
    assert out_pp.shape == (B, S, d_model)
    assert jnp.allclose(out_pp, ref, atol=1e-4, rtol=1e-4)

    # 3) bf16 path (perf configuration: bf16 operands feed the MXU at full
    #    rate, accumulation stays f32). Looser tolerance vs f32 reference.
    bf = jnp.bfloat16
    out_bf16 = ff_layer(x.astype(bf), w1.astype(bf), b1.astype(bf),
                        w2.astype(bf), b2.astype(bf))
    jax.block_until_ready(out_bf16)
    assert out_bf16.shape == (B, S, d_model)
    assert out_bf16.dtype == bf
    assert jnp.allclose(out_bf16.astype(jnp.float32), ref, atol=5e-2, rtol=5e-2)

    print("KERNEL_OK")
</pallas_src>

<mosaic_0001>
module attributes {stable_mosaic.version = 11 : i64} {
  func.func @_ffn_resident_kernel(%arg0: i32, %arg1: memref<16x128xf32, #tpu.memory_space<vmem>>, %arg2: memref<128x128xf32, #tpu.memory_space<vmem>>, %arg3: memref<1x128xf32, #tpu.memory_space<vmem>>, %arg4: memref<128x128xf32, #tpu.memory_space<vmem>>, %arg5: memref<1x128xf32, #tpu.memory_space<vmem>>, %arg6: memref<16x128xf32, #tpu.memory_space<vmem>>) attributes {dimension_semantics = [#tpu.dimension_semantics<parallel>], iteration_bounds = array<i64: 1>, scalar_prefetch = 0 : i64, scratch_operands = 0 : i64, tpu.core_type = #tpu.core_type<tc>, window_params = [{transform_indices = @transform_0, window_bounds = array<i64: 16, 128>}, {pipeline_mode = #tpu.pipeline_mode<synchronous>, transform_indices = @transform_1, window_bounds = array<i64: 128, 128>}, {pipeline_mode = #tpu.pipeline_mode<synchronous>, transform_indices = @transform_2, window_bounds = array<i64: 1, 128>}, {pipeline_mode = #tpu.pipeline_mode<synchronous>, transform_indices = @transform_3, window_bounds = array<i64: 128, 128>}, {pipeline_mode = #tpu.pipeline_mode<synchronous>, transform_indices = @transform_4, window_bounds = array<i64: 1, 128>}, {transform_indices = @transform_5, window_bounds = array<i64: 16, 128>}]} {
    %c0 = arith.constant 0 : index
    %c0_0 = arith.constant 0 : index
    %0 = vector.load %arg1[%c0, %c0_0] : memref<16x128xf32, #tpu.memory_space<vmem>>, vector<16x128xf32>
    %c0_1 = arith.constant 0 : index
    %c0_2 = arith.constant 0 : index
    %1 = vector.load %arg2[%c0_1, %c0_2] : memref<128x128xf32, #tpu.memory_space<vmem>>, vector<128x128xf32>
    %cst = arith.constant dense<0.000000e+00> : vector<16x128xf32>
    %2 = tpu.matmul %0, %1, %cst {dimension_numbers = #tpu.dot_dimension_numbers<[1], [0], [0], [1], [0, 0, 1, 1], [], []>} : vector<16x128xf32>, vector<128x128xf32>, vector<16x128xf32> -> vector<16x128xf32>
    %c0_3 = arith.constant 0 : index
    %c0_4 = arith.constant 0 : index
    %3 = vector.load %arg3[%c0_3, %c0_4] : memref<1x128xf32, #tpu.memory_space<vmem>>, vector<1x128xf32>
    %4 = vector.broadcast %3 : vector<1x128xf32> to vector<16x128xf32>
    %5 = arith.addf %2, %4 : vector<16x128xf32>
    %cst_5 = arith.constant 0.000000e+00 : f32
    %6 = vector.broadcast %cst_5 : f32 to vector<16x128xf32>
    %7 = arith.maximumf %5, %6 : vector<16x128xf32>
    %c0_6 = arith.constant 0 : index
    %c0_7 = arith.constant 0 : index
    %8 = vector.load %arg4[%c0_6, %c0_7] : memref<128x128xf32, #tpu.memory_space<vmem>>, vector<128x128xf32>
    %cst_8 = arith.constant dense<0.000000e+00> : vector<16x128xf32>
    %9 = tpu.matmul %7, %8, %cst_8 {dimension_numbers = #tpu.dot_dimension_numbers<[1], [0], [0], [1], [0, 0, 1, 1], [], []>} : vector<16x128xf32>, vector<128x128xf32>, vector<16x128xf32> -> vector<16x128xf32>
    %c0_9 = arith.constant 0 : index
    %c0_10 = arith.constant 0 : index
    %10 = vector.load %arg5[%c0_9, %c0_10] : memref<1x128xf32, #tpu.memory_space<vmem>>, vector<1x128xf32>
    %11 = vector.broadcast %10 : vector<1x128xf32> to vector<16x128xf32>
    %12 = arith.addf %9, %11 : vector<16x128xf32>
    %c0_11 = arith.constant 0 : index
    %c0_12 = arith.constant 0 : index
    %13 = vector.load %arg6[%c0_11, %c0_12] : memref<16x128xf32, #tpu.memory_space<vmem>>, vector<16x128xf32>
    tpu.vector_store %arg6[%c0_11, %c0_12], %12 {strides = array<i32>} : memref<16x128xf32, #tpu.memory_space<vmem>>, vector<16x128xf32>,
    return
  }
  func.func @transform_0(%arg0: i32) -> (i32, i32) {
    %c0_i32 = arith.constant 0 : i32
    %c0_i32_0 = arith.constant 0 : i32
    return %arg0, %c0_i32 : i32, i32
  }
  func.func @transform_1(%arg0: i32) -> (i32, i32) {
    %c0_i32 = arith.constant 0 : i32
    %c0_i32_0 = arith.constant 0 : i32
    %c0_i32_1 = arith.constant 0 : i32
    return %c0_i32, %c0_i32_0 : i32, i32
  }
  func.func @transform_2(%arg0: i32) -> (i32, i32) {
    %c0_i32 = arith.constant 0 : i32
    %c0_i32_0 = arith.constant 0 : i32
    %c0_i32_1 = arith.constant 0 : i32
    return %c0_i32, %c0_i32_0 : i32, i32
  }
  func.func @transform_3(%arg0: i32) -> (i32, i32) {
    %c0_i32 = arith.constant 0 : i32
    %c0_i32_0 = arith.constant 0 : i32
    %c0_i32_1 = arith.constant 0 : i32
    return %c0_i32, %c0_i32_0 : i32, i32
  }
  func.func @transform_4(%arg0: i32) -> (i32, i32) {
    %c0_i32 = arith.constant 0 : i32
    %c0_i32_0 = arith.constant 0 : i32
    %c0_i32_1 = arith.constant 0 : i32
    return %c0_i32, %c0_i32_0 : i32, i32
  }
  func.func @transform_5(%arg0: i32) -> (i32, i32) {
    %c0_i32 = arith.constant 0 : i32
    %c0_i32_0 = arith.constant 0 : i32
    return %arg0, %c0_i32 : i32, i32
  }
}

</mosaic_0001>

<bundles_post_ra>
// kernel: ff_layer.1
= control target key start
LH: loop header
LB: loop body
LE: loop exit
PB: predicated region body
PF: predicated region fallthrough
CT: control target
= control target key end

     0   :  { %s294_s1 = inlined_call_operand.vmem [shape: f32[128,128], index: 1, kind: input, shape index: {}]   ;;  %s295_s3 = inlined_call_operand.vmem [shape: f32[128,128], index: 3, kind: input, shape index: {}]   ;;  %s296_s2 = inlined_call_operand.vmem [shape: f32[1,128], index: 2, kind: input, shape index: {}]   ;;  %s297_s0 = inlined_call_operand.vmem [shape: f32[16,128], index: 0, kind: input, shape index: {}]   ;;  %s298_s4 = inlined_call_operand.vmem [shape: f32[1,128], index: 4, kind: input, shape index: {}]   ;;  %s299_s5 = inlined_call_operand.vmem [shape: f32[16,128], index: 5, kind: output, shape index: {}]  }
   0x1   :  { %v37_v0 = vld [vmem:[%s294_s1 + $0x78] sm:$0xff]  ;;  %v36_v1 = vld [vmem:[%s294_s1 + $0x70] sm:$0xff]  ;;  %v35_v2 = vld [vmem:[%s294_s1 + $0x68] sm:$0xff] }
   0x2   :  { %116 = vmatpush.msra.mxu2 %v37_v0  ;;  %42 = vmatpush.msra.mxu0 %v37_v0  ;;  %v34_v3 = vld [vmem:[%s294_s1 + $0x60] sm:$0xff]  ;;  %v33_v4 = vld [vmem:[%s294_s1 + $0x58] sm:$0xff]  ;;  %v81_v6 = vld [vmem:[%s295_s3 + $0x70] sm:$0xff] }
   0x3   :  { %v82_v5 = vld [vmem:[%s295_s3 + $0x78] sm:$0xff]  ;;  %v32_v7 = vld [vmem:[%s294_s1 + $0x50] sm:$0xff]  ;;  %v80_v8 = vld [vmem:[%s295_s3 + $0x68] sm:$0xff] }
   0x4   :  { %117 = vmatpush.msra.mxu2 %v36_v1  ;;  %43 = vmatpush.msra.mxu0 %v36_v1  ;;  %v31_v9 = vld [vmem:[%s294_s1 + $0x48] sm:$0xff]  ;;  %v79_v10 = vld [vmem:[%s295_s3 + $0x60] sm:$0xff]  ;;  %v78_v12 = vld [vmem:[%s295_s3 + $0x58] sm:$0xff] }
   0x5   :  { %132 = vmatpush.msra.mxu3 %v82_v5  ;;  %87 = vmatpush.msra.mxu1 %v82_v5  ;;  %v30_v11 = vld [vmem:[%s294_s1 + $0x40] sm:$0xff]  ;;  %v29_v13 = vld [vmem:[%s294_s1 + $0x38] sm:$0xff]  ;;  %v77_v14 = vld [vmem:[%s295_s3 + $0x50] sm:$0xff] }
   0x6   :  { %118 = vmatpush.msra.mxu2 %v35_v2  ;;  %44 = vmatpush.msra.mxu0 %v35_v2  ;;  %v28_v15 = vld [vmem:[%s294_s1 + $0x30] sm:$0xff]  ;;  %v76_v16 = vld [vmem:[%s295_s3 + $0x48] sm:$0xff]  ;;  %v75_v18 = vld [vmem:[%s295_s3 + $0x40] sm:$0xff] }
   0x7   :  { %133 = vmatpush.msra.mxu3 %v81_v6  ;;  %88 = vmatpush.msra.mxu1 %v81_v6  ;;  %v27_v17 = vld [vmem:[%s294_s1 + $0x28] sm:$0xff]  ;;  %v26_v19 = vld [vmem:[%s294_s1 + $0x20] sm:$0xff]  ;;  %v74_v20 = vld [vmem:[%s295_s3 + $0x38] sm:$0xff] }
   0x8   :  { %119 = vmatpush.msra.mxu2 %v34_v3  ;;  %45 = vmatpush.msra.mxu0 %v34_v3  ;;  %v25_v21 = vld [vmem:[%s294_s1 + $0x18] sm:$0xff]  ;;  %v73_v22 = vld [vmem:[%s295_s3 + $0x30] sm:$0xff]  ;;  %v72_v24 = vld [vmem:[%s295_s3 + $0x28] sm:$0xff] }
   0x9   :  { %134 = vmatpush.msra.mxu3 %v80_v8  ;;  %89 = vmatpush.msra.mxu1 %v80_v8  ;;  %v24_v23 = vld [vmem:[%s294_s1 + $0x10] sm:$0xff]  ;;  %v23_v25 = vld [vmem:[%s294_s1 + $0x8] sm:$0xff]  ;;  %v71_v26 = vld [vmem:[%s295_s3 + $0x20] sm:$0xff] }
   0xa   :  { %120 = vmatpush.msra.mxu2 %v33_v4  ;;  %46 = vmatpush.msra.mxu0 %v33_v4  ;;  %v22_v27 = vld [vmem:[%s294_s1] sm:$0xff]  ;;  %v21_v28 = vld [vmem:[%s297_s0 + $0x8] sm:$0xff]  ;;  %v70_v30 = vld [vmem:[%s295_s3 + $0x18] sm:$0xff] }
   0xb   :  { %135 = vmatpush.msra.mxu3 %v79_v10  ;;  %90 = vmatpush.msra.mxu1 %v79_v10  ;;  %v20_v29 = vld [vmem:[%s297_s0] sm:$0xff]  ;;  %v69_v31 = vld [vmem:[%s295_s3 + $0x10] sm:$0xff]  ;;  %v68_v32 = vld [vmem:[%s295_s3 + $0x8] sm:$0xff] }
   0xc   :  { %121 = vmatpush.msra.mxu2 %v32_v7  ;;  %47 = vmatpush.msra.mxu0 %v32_v7  ;;  %v67_v33 = vld [vmem:[%s295_s3] sm:$0xff] }
   0xd   :  { %136 = vmatpush.msra.mxu3 %v78_v12  ;;  %91 = vmatpush.msra.mxu1 %v78_v12  ;;  %v148_v34 = vld [vmem:[%s296_s2] ss:$0 sm:$0xff] }
   0xe   :  { %122 = vmatpush.msra.mxu2 %v31_v9  ;;  %48 = vmatpush.msra.mxu0 %v31_v9  ;;  %v149_v41 = vld [vmem:[%s298_s4] ss:$0 sm:$0xff] }
   0xf   :  { %137 = vmatpush.msra.mxu3 %v77_v14  ;;  %92 = vmatpush.msra.mxu1 %v77_v14 }
  0x10   :  { %123 = vmatpush.msra.mxu2 %v30_v11  ;;  %49 = vmatpush.msra.mxu0 %v30_v11 }
  0x11   :  { %138 = vmatpush.msra.mxu3 %v76_v16  ;;  %93 = vmatpush.msra.mxu1 %v76_v16 }
  0x12   :  { %124 = vmatpush.msra.mxu2 %v29_v13  ;;  %50 = vmatpush.msra.mxu0 %v29_v13 }
  0x13   :  { %139 = vmatpush.msra.mxu3 %v75_v18  ;;  %94 = vmatpush.msra.mxu1 %v75_v18 }
  0x14   :  { %125 = vmatpush.msra.mxu2 %v28_v15  ;;  %51 = vmatpush.msra.mxu0 %v28_v15 }
  0x15   :  { %140 = vmatpush.msra.mxu3 %v74_v20  ;;  %95 = vmatpush.msra.mxu1 %v74_v20 }
  0x16   :  { %126 = vmatpush.msra.mxu2 %v27_v17  ;;  %52 = vmatpush.msra.mxu0 %v27_v17 }
  0x17   :  { %141 = vmatpush.msra.mxu3 %v73_v22  ;;  %96 = vmatpush.msra.mxu1 %v73_v22 }
  0x18   :  { %127 = vmatpush.msra.mxu2 %v26_v19  ;;  %53 = vmatpush.msra.mxu0 %v26_v19 }
  0x19   :  { %142 = vmatpush.msra.mxu3 %v72_v24  ;;  %97 = vmatpush.msra.mxu1 %v72_v24 }
  0x1a   :  { %128 = vmatpush.msra.mxu2 %v25_v21  ;;  %54 = vmatpush.msra.mxu0 %v25_v21 }
  0x1b   :  { %143 = vmatpush.msra.mxu3 %v71_v26  ;;  %98 = vmatpush.msra.mxu1 %v71_v26 }
  0x1c   :  { %129 = vmatpush.msra.mxu2 %v24_v23  ;;  %55 = vmatpush.msra.mxu0 %v24_v23 }
  0x1d   :  { %144 = vmatpush.msra.mxu3 %v70_v30  ;;  %99 = vmatpush.msra.mxu1 %v70_v30 }
  0x1e   :  { %130 = vmatpush.msra.mxu2 %v23_v25  ;;  %56 = vmatpush.msra.mxu0 %v23_v25 }
  0x1f   :  { %145 = vmatpush.msra.mxu3 %v69_v31  ;;  %100 = vmatpush.msra.mxu1 %v69_v31 }
  0x20   :  { %131 = vmatpush.msra.mxu2 %v22_v27  ;;  %57 = vmatpush.msra.mxu0 %v22_v27 }
  0x21   :  { %61 = vmatmul.f32.vlgmr.msra.gmra.mxu2 %v21_v28  ;;  %58 = vmatmul.f32.vlgmr.msra.gmra.mxu0 %v20_v29 }
  0x22   :  { %146 = vmatpush.msra.mxu3 %v68_v32  ;;  %101 = vmatpush.msra.mxu1 %v68_v32 }
  0x24   :  { %147 = vmatpush.msra.mxu3 %v67_v33  ;;  %102 = vmatpush.msra.mxu1 %v67_v33 }
  0x9e   :  { %v59_v35 = vpop.f32.mrf.mxu0 }
  0x9f   :  { %v60_v36 = vadd.f32 %v148_v34, %v59_v35 }
  0xa1   :  { %v65_v37 = vmax.f32 %v60_v36, 0.0 }
  0xa3   :  { %103 = vmatmul.f32.vlgmr.msra.gmra.mxu1 %v65_v37 }
  0xa4   :  { %v62_v38 = vpop.f32.mrf.mxu2 }
  0xa5   :  { %v63_v39 = vadd.f32 %v148_v34, %v62_v38 }
  0xa7   :  { %v66_v40 = vmax.f32 %v63_v39, 0.0 }
  0xa9   :  { %106 = vmatmul.f32.vlgmr.msra.gmra.mxu3 %v66_v40 }
 0x120   :  { %v104_v42 = vpop.f32.mrf.mxu1 }
 0x121   :  { %v105_v43 = vadd.f32 %v149_v41, %v104_v42 }
 0x123   :  { %110 = vst [vmem:[%s299_s5] sm:$0xff] %v105_v43 }
 0x12c   :  { %v107_v44 = vpop.f32.mrf.mxu3 }
 0x12d   :  { %v108_v45 = vadd.f32 %v149_v41, %v107_v44 }
 0x12f   :  { %111 = vst [vmem:[%s299_s5 + $0x8] sm:$0xff] %v108_v45 }

</bundles_post_ra>
